<compile_context>
chip_gen: v6e
topology: v6e:2x2x1
jax: 0.10.0
libtpu: 0.0.40
codegen_flags: <defaults>
</compile_context>

<pallas_src>
import functools

import jax
import jax.numpy as jnp
import numpy as np
from jax import lax
from jax.experimental import pallas as pl
from jax.experimental.pallas import tpu as pltpu


def moe_kernel(gate_ref, x_ref, w1_ref, b1_ref, w2_ref, b2_ref, o_ref):
    e = pl.program_id(1)

    @pl.when(e == 0)
    def _init():
        o_ref[...] = jnp.zeros_like(o_ref)

    # Per-token gate for this expert, extracted in-kernel from the tiny (bm, E)
    # gate block (mask + reduce over E lanes; avoids any expanded gate tensor
    # and any dynamic lane slicing).
    gate = gate_ref[...]                                                 # (bm, E) f32
    lane = lax.broadcasted_iota(jnp.int32, gate.shape, 1)
    g = jnp.sum(jnp.where(lane == e, gate, 0.0), axis=1, keepdims=True)  # (bm, 1) f32

    # Expert layer 1: (bm, D_in) @ (D_in, D_in) + b1   (bf16 operands, f32 accumulate).
    x_bf = x_ref[...].astype(jnp.bfloat16)
    h = jnp.dot(x_bf, w1_ref[...], preferred_element_type=jnp.float32)
    h = h + b1_ref[...]
    # TODO(synk): nn.Dropout is identity here (eval-mode semantics only).

    # Expert layer 2: (bm, D_in) @ (D_in, D_out) + b2, gated in f32, accumulated
    # directly into the VMEM-resident output block (reduction over the expert axis).
    y = jnp.dot(h.astype(jnp.bfloat16), w2_ref[...],
                preferred_element_type=jnp.float32)
    o_ref[...] += g * (y + b2_ref[...])


def prepare_moe_params(w1, b1, w2, b2):
    """One-time repack, hoisted out of the per-call path: weights to bf16
    (halves weight HBM traffic), biases stay f32. No per-call transpose/reshape."""
    return (w1.astype(jnp.bfloat16), b1.astype(jnp.float32),
            w2.astype(jnp.bfloat16), b2.astype(jnp.float32))


def _vmem_limit_bytes(bm, d_in, d_out, e):
    bf, f32 = 2, 4
    per_step = (bm * e * f32          # gate block
                + bm * d_in * f32     # x block
                + d_in * d_in * bf    # w1 block
                + d_in * f32          # b1 block
                + d_in * d_out * bf   # w2 block
                + d_out * f32         # b2 block
                + bm * d_out * f32)   # output block
    # ×2 for BlockSpec double-buffering, plus margin for internal scratch.
    return int(min(2 * per_step + (4 << 20), 100 << 20))


@jax.jit
def moe_forward(x, moe_weight, w1_bf, b1, w2_bf, b2):
    """x: (B, D_in) f32; moe_weight: (B, E) f32; w1_bf: (E, D_in, D_in) bf16;
       b1: (E, 1, D_in) f32; w2_bf: (E, D_in, D_out) bf16; b2: (E, 1, D_out) f32.
       Returns (B, D_out) f32."""
    B, D_in = x.shape
    E, _, D_out = w2_bf.shape

    # Batch tile: "parallel" grid axis (feeds v7x's 2 TensorCores at large B).
    bm = B if B <= 256 else 256
    assert B % bm == 0 and bm % 8 == 0, "B must be a multiple of 8 (sublane tiling)"
    grid = (B // bm, E)   # expert (reduction) axis last

    return pl.pallas_call(
        moe_kernel,
        out_shape=jax.ShapeDtypeStruct((B, D_out), jnp.float32),
        grid_spec=pltpu.PrefetchScalarGridSpec(
            num_scalar_prefetch=0,
            grid=grid,
            in_specs=[
                pl.BlockSpec((bm, E), lambda i, e: (i, 0)),               # gate
                pl.BlockSpec((bm, D_in), lambda i, e: (i, 0)),            # x
                pl.BlockSpec((None, D_in, D_in), lambda i, e: (e, 0, 0)),  # w1[e]
                pl.BlockSpec((None, 1, D_in), lambda i, e: (e, 0, 0)),     # b1[e]
                pl.BlockSpec((None, D_in, D_out), lambda i, e: (e, 0, 0)),  # w2[e]
                pl.BlockSpec((None, 1, D_out), lambda i, e: (e, 0, 0)),     # b2[e]
            ],
            out_specs=pl.BlockSpec((bm, D_out), lambda i, e: (i, 0)),
        ),
        compiler_params=pltpu.CompilerParams(
            dimension_semantics=("parallel", "arbitrary"),
            vmem_limit_bytes=_vmem_limit_bytes(bm, D_in, D_out, E),
        ),
    )(moe_weight, x, w1_bf, b1, w2_bf, b2)


def moe_reference(x, w1, b1, w2, b2, moe_weight):
    # Pure-JAX f32 reference of the PyTorch forward (eval mode).
    outs = []
    for e in range(w1.shape[0]):
        h = x @ w1[e] + b1[e]
        outs.append(h @ w2[e] + b2[e])
    outputs = jnp.stack(outs, axis=2)          # (B, D_out, E)
    weights = moe_weight[:, None, :]           # (B, 1, E) -> broadcast
    return jnp.sum(outputs * weights, axis=2)


if __name__ == "__main__":
    # Small shapes consistent with the module (input_dim = output_dim), TPU-tile friendly.
    B, D_IN, D_OUT, E = 8, 128, 128, 4

    key = jax.random.PRNGKey(0)
    kx, kw1, kb1, kw2, kb2, kg = jax.random.split(key, 6)

    # Deterministic parameter init (PyTorch Linear-style uniform ±1/sqrt(fan_in)).
    bound1 = 1.0 / np.sqrt(D_IN)
    w1 = jax.random.uniform(kw1, (E, D_IN, D_IN), jnp.float32, -bound1, bound1)
    b1 = jax.random.uniform(kb1, (E, 1, D_IN), jnp.float32, -bound1, bound1)
    w2 = jax.random.uniform(kw2, (E, D_IN, D_OUT), jnp.float32, -bound1, bound1)
    b2 = jax.random.uniform(kb2, (E, 1, D_OUT), jnp.float32, -bound1, bound1)

    x = jax.random.normal(kx, (B, D_IN), jnp.float32)
    moe_weight = jax.nn.softmax(jax.random.normal(kg, (B, E), jnp.float32), axis=-1)

    # One-time weight repack (outside the per-call path), then the kernel call.
    params = prepare_moe_params(w1, b1, w2, b2)
    out = moe_forward(x, moe_weight, *params)
    out = jax.block_until_ready(out)

    ref = moe_reference(x, w1, b1, w2, b2, moe_weight)
    # bf16 weight/activation streaming -> looser tolerance vs the f32 reference.
    np.testing.assert_allclose(np.asarray(out), np.asarray(ref), rtol=2e-2, atol=2e-2)

    print("KERNEL_OK")
</pallas_src>

<mosaic_0001>
module attributes {stable_mosaic.version = 11 : i64} {
  func.func @moe_kernel(%arg0: i32, %arg1: i32, %arg2: memref<8x4xf32, #tpu.memory_space<vmem>>, %arg3: memref<8x128xf32, #tpu.memory_space<vmem>>, %arg4: memref<1x128x128xbf16, #tpu.memory_space<vmem>>, %arg5: memref<1x1x128xf32, #tpu.memory_space<vmem>>, %arg6: memref<1x128x128xbf16, #tpu.memory_space<vmem>>, %arg7: memref<1x1x128xf32, #tpu.memory_space<vmem>>, %arg8: memref<8x128xf32, #tpu.memory_space<vmem>>) attributes {dimension_semantics = [#tpu.dimension_semantics<parallel>, #tpu.dimension_semantics<arbitrary>], iteration_bounds = array<i64: 1, 4>, scalar_prefetch = 0 : i64, scratch_operands = 0 : i64, tpu.core_type = #tpu.core_type<tc>, window_params = [{transform_indices = @transform_0, window_bounds = array<i64: 8, 4>}, {transform_indices = @transform_1, window_bounds = array<i64: 8, 128>}, {transform_indices = @transform_2, window_bounds = array<i64: 1, 128, 128>}, {transform_indices = @transform_3, window_bounds = array<i64: 1, 1, 128>}, {transform_indices = @transform_4, window_bounds = array<i64: 1, 128, 128>}, {transform_indices = @transform_5, window_bounds = array<i64: 1, 1, 128>}, {transform_indices = @transform_6, window_bounds = array<i64: 8, 128>}]} {
    %c0_i32 = arith.constant 0 : i32
    %0 = arith.cmpi eq, %arg1, %c0_i32 : i32
    %1 = arith.extui %0 : i1 to i32
    %c0_i32_0 = arith.constant 0 : i32
    %2 = arith.cmpi ne, %1, %c0_i32_0 : i32
    scf.if %2 {
      %cst_23 = arith.constant 0.000000e+00 : f32
      %33 = vector.broadcast %cst_23 : f32 to vector<8x128xf32>
      %c0_24 = arith.constant 0 : index
      %c0_25 = arith.constant 0 : index
      %34 = vector.load %arg8[%c0_24, %c0_25] : memref<8x128xf32, #tpu.memory_space<vmem>>, vector<8x128xf32>
      tpu.vector_store %arg8[%c0_24, %c0_25], %33 {strides = array<i32>} : memref<8x128xf32, #tpu.memory_space<vmem>>, vector<8x128xf32>,
    } else {
    }
    %c0 = arith.constant 0 : index
    %c0_1 = arith.constant 0 : index
    %3 = vector.load %arg2[%c0, %c0_1] : memref<8x4xf32, #tpu.memory_space<vmem>>, vector<8x4xf32>
    %4 = tpu.iota {dimensions = array<i32: 1>} : vector<8x4xi32>
    %5 = vector.broadcast %arg1 : i32 to vector<8x4xi32>
    %6 = arith.cmpi eq, %4, %5 : vector<8x4xi32>
    %cst = arith.constant 0.000000e+00 : f32
    %7 = vector.broadcast %cst : f32 to vector<8x4xf32>
    %8 = arith.select %6, %3, %7 : vector<8x4xi1>, vector<8x4xf32>
    %cst_2 = arith.constant dense<0.000000e+00> : vector<8xf32>
    %9 = vector.multi_reduction <add>, %8, %cst_2 [1] : vector<8x4xf32> to vector<8xf32>
    %10 = vector.shape_cast %9 : vector<8xf32> to vector<8x1xf32>
    %c0_3 = arith.constant 0 : index
    %c0_4 = arith.constant 0 : index
    %11 = vector.load %arg3[%c0_3, %c0_4] : memref<8x128xf32, #tpu.memory_space<vmem>>, vector<8x128xf32>
    %12 = arith.truncf %11 : vector<8x128xf32> to vector<8x128xbf16>
    %c0_5 = arith.constant 0 : index
    %c0_6 = arith.constant 0 : index
    %c0_7 = arith.constant 0 : index
    %13 = vector.load %arg4[%c0_5, %c0_6, %c0_7] : memref<1x128x128xbf16, #tpu.memory_space<vmem>>, vector<1x128x128xbf16>
    %14 = vector.shape_cast %13 : vector<1x128x128xbf16> to vector<128x128xbf16>
    %cst_8 = arith.constant dense<0.000000e+00> : vector<8x128xf32>
    %15 = tpu.matmul %12, %14, %cst_8 {dimension_numbers = #tpu.dot_dimension_numbers<[1], [0], [0], [1], [0, 0, 1, 1], [], []>} : vector<8x128xbf16>, vector<128x128xbf16>, vector<8x128xf32> -> vector<8x128xf32>
    %c0_9 = arith.constant 0 : index
    %c0_10 = arith.constant 0 : index
    %c0_11 = arith.constant 0 : index
    %16 = vector.load %arg5[%c0_9, %c0_10, %c0_11] : memref<1x1x128xf32, #tpu.memory_space<vmem>>, vector<1x1x128xf32>
    %17 = vector.shape_cast %16 : vector<1x1x128xf32> to vector<1x128xf32>
    %18 = vector.broadcast %17 : vector<1x128xf32> to vector<8x128xf32>
    %19 = arith.addf %15, %18 : vector<8x128xf32>
    %20 = arith.truncf %19 : vector<8x128xf32> to vector<8x128xbf16>
    %c0_12 = arith.constant 0 : index
    %c0_13 = arith.constant 0 : index
    %c0_14 = arith.constant 0 : index
    %21 = vector.load %arg6[%c0_12, %c0_13, %c0_14] : memref<1x128x128xbf16, #tpu.memory_space<vmem>>, vector<1x128x128xbf16>
    %22 = vector.shape_cast %21 : vector<1x128x128xbf16> to vector<128x128xbf16>
    %cst_15 = arith.constant dense<0.000000e+00> : vector<8x128xf32>
    %23 = tpu.matmul %20, %22, %cst_15 {dimension_numbers = #tpu.dot_dimension_numbers<[1], [0], [0], [1], [0, 0, 1, 1], [], []>} : vector<8x128xbf16>, vector<128x128xbf16>, vector<8x128xf32> -> vector<8x128xf32>
    %c0_16 = arith.constant 0 : index
    %c0_17 = arith.constant 0 : index
    %24 = vector.load %arg8[%c0_16, %c0_17] : memref<8x128xf32, #tpu.memory_space<vmem>>, vector<8x128xf32>
    %c0_18 = arith.constant 0 : index
    %c0_19 = arith.constant 0 : index
    %c0_20 = arith.constant 0 : index
    %25 = vector.load %arg7[%c0_18, %c0_19, %c0_20] : memref<1x1x128xf32, #tpu.memory_space<vmem>>, vector<1x1x128xf32>
    %26 = vector.shape_cast %25 : vector<1x1x128xf32> to vector<1x128xf32>
    %27 = vector.broadcast %26 : vector<1x128xf32> to vector<8x128xf32>
    %28 = arith.addf %23, %27 : vector<8x128xf32>
    %29 = vector.broadcast %10 : vector<8x1xf32> to vector<8x128xf32>
    %30 = arith.mulf %29, %28 : vector<8x128xf32>
    %31 = arith.addf %24, %30 : vector<8x128xf32>
    %c0_21 = arith.constant 0 : index
    %c0_22 = arith.constant 0 : index
    %32 = vector.load %arg8[%c0_21, %c0_22] : memref<8x128xf32, #tpu.memory_space<vmem>>, vector<8x128xf32>
    tpu.vector_store %arg8[%c0_21, %c0_22], %31 {strides = array<i32>} : memref<8x128xf32, #tpu.memory_space<vmem>>, vector<8x128xf32>,
    return
  }
  func.func @transform_0(%arg0: i32, %arg1: i32) -> (i32, i32) {
    %c0_i32 = arith.constant 0 : i32
    %c0_i32_0 = arith.constant 0 : i32
    return %arg0, %c0_i32 : i32, i32
  }
  func.func @transform_1(%arg0: i32, %arg1: i32) -> (i32, i32) {
    %c0_i32 = arith.constant 0 : i32
    %c0_i32_0 = arith.constant 0 : i32
    return %arg0, %c0_i32 : i32, i32
  }
  func.func @transform_2(%arg0: i32, %arg1: i32) -> (i32, i32, i32) {
    %c0_i32 = arith.constant 0 : i32
    %c0_i32_0 = arith.constant 0 : i32
    %c0_i32_1 = arith.constant 0 : i32
    return %arg1, %c0_i32, %c0_i32_0 : i32, i32, i32
  }
  func.func @transform_3(%arg0: i32, %arg1: i32) -> (i32, i32, i32) {
    %c0_i32 = arith.constant 0 : i32
    %c0_i32_0 = arith.constant 0 : i32
    %c0_i32_1 = arith.constant 0 : i32
    return %arg1, %c0_i32, %c0_i32_0 : i32, i32, i32
  }
  func.func @transform_4(%arg0: i32, %arg1: i32) -> (i32, i32, i32) {
    %c0_i32 = arith.constant 0 : i32
    %c0_i32_0 = arith.constant 0 : i32
    %c0_i32_1 = arith.constant 0 : i32
    return %arg1, %c0_i32, %c0_i32_0 : i32, i32, i32
  }
  func.func @transform_5(%arg0: i32, %arg1: i32) -> (i32, i32, i32) {
    %c0_i32 = arith.constant 0 : i32
    %c0_i32_0 = arith.constant 0 : i32
    %c0_i32_1 = arith.constant 0 : i32
    return %arg1, %c0_i32, %c0_i32_0 : i32, i32, i32
  }
  func.func @transform_6(%arg0: i32, %arg1: i32) -> (i32, i32) {
    %c0_i32 = arith.constant 0 : i32
    %c0_i32_0 = arith.constant 0 : i32
    return %arg0, %c0_i32 : i32, i32
  }
}

</mosaic_0001>

<bundles_post_ra>
// kernel: moe_forward.1
= control target key start
LH: loop header
LB: loop body
LE: loop exit
PB: predicated region body
PF: predicated region fallthrough
CT: control target
= control target key end

     0   :  { %s1321_s0 = inlined_call_operand.vmem [shape: f32[8,4], index: 0, kind: input, shape index: {}]   ;;  %s1322_s1 = inlined_call_operand.vmem [shape: f32[8,128], index: 1, kind: input, shape index: {}]   ;;  %s1323_s2 = inlined_call_operand.hbm [shape: bf16[4,128,128], index: 2, kind: input, shape index: {}]   ;;  %s1324_s3 = inlined_call_operand.vmem [shape: f32[4,1,128], index: 3, kind: input, shape index: {}]   ;;  %s1325_s4 = inlined_call_operand.hbm [shape: bf16[4,128,128], index: 4, kind: input, shape index: {}]   ;;  %s1326_s5 = inlined_call_operand.vmem [shape: f32[4,1,128], index: 5, kind: input, shape index: {}]   ;;  %s1327_s6 = inlined_call_operand.hbm [shape: f32[8,128], index: 6, kind: output, shape index: {}]  }
   0x1   :  { %1329 = sst [smem:[#allocation11_spill]] %s1323_s2 }
   0x2   :  { %11 = vsyncpa [#allocation3], 0 }
   0x3   :  { %13 = vsyncpa [#allocation3 + $0x1], 0 }
   0x4   :  { %14 = vsyncpa [#allocation6], 0 }
   0x5   :  { %16 = vsyncpa [#allocation6 + $0x1], 0 }
   0x6   :  { %17 = vsyncpa [#allocation4], 0  ;;  %s1131_s21 = smov 0   ;;  %s1133_s22 = smov 0  }
   0x7   :  { %s1135_s23 = smov 0   ;;  %s1137_s24 = smov 0  }
   0x8   :  { %s1139_s25 = smov 0   ;;  %s1141_s26 = smov 0  }
   0x9 LB: > { %s1328_s27 = sadd.s32 4294967295, %s1086_s26   ;;  %s32_s28 = sadd.s32 1, %s1082_s25  ;;  %s1086_s26 = sphi %s1141_s26, %s23_s26   ;;  %s1082_s25 = sphi %s1139_s25, %s1341_s25   ;;  %s1078_s24 = sphi %s1137_s24, %s1340_s24   ;;  %s1074_s23 = sphi %s1135_s23, %s1339_s23   ;;  %s1070_s22 = sphi %s1133_s22, %s1338_s22   ;;  %s1066_s21 = sphi %s1131_s21, %s1337_s21  }
   0xa   : > { %p33_p0 = scmp.ge.s32.totalorder %s32_s28, 4  ;;  %s94_s29 = sadd.s32 1, %s1074_s23 }
   0xb   : > { %p101_p1 = scmp.ne.s32.totalorder %s1074_s23, %s1070_s22  ;;  %p102_p2 = scmp.eq.s32.totalorder %s1086_s26, 0 }
   0xc   : > { %s1343_s28 = smov (%p33_p0, %s32_s28), 0  ;;  %p107_p4 = scmp.ne.s32.totalorder %s1070_s22, %s1066_s21 }
   0xd   : > { %p1167_p3 = por %p102_p2, %p101_p1  ;;  %s91_s7 = ssub.s32 %s1082_s25, %s1343_s28 }
   0xe   : > { %p108_p5 = scmp.eq.s32.totalorder %s1328_s27, 0  ;;  %p92_p6 = scmp.eq.s32.totalorder %s91_s7, 0 }
   0xf   : > { %p875_p8 = scmp.lt.s32.totalorder %s1086_s26, 4  ;;  %s1185_s10 = sand.u32 1, %s1074_s23  }
  0x10   : > { %p1176_p7 = por %p108_p5, %p107_p4  ;;  %s800_s11 = sshll.u32 %s1082_s25, 10 }
  0x11   : > { %s1182_s9 = scalar_select %p92_p6, %s1074_s23, %s94_s29  }
  0x12   : > { %s768_s12 = sshll.u32 %s1185_s10, 6  ;;  %s1332_s2 = sld [smem:[#allocation11_spill]] }
  0x13   : > { %s253_s16 = scalar_lea.vmem [#allocation2], %s768_s12  ;;  %p1196_p9 = pnand %p875_p8, %p1167_p3 }
  0x14   : > { %s260_s17 = sshll.u32 %s253_s16, 4  ;;  %s250_s19 = scalar_lea.sflag [#allocation3], %s1185_s10  ;;  %s261_s17 = int_to_ptr.vmem [resolvable:$true] %s260_s17 }
  0x15   : > { %p950_p10 = pneg %p1196_p9  ;;  %s961_s20 = scalar_lea.vmem %s261_s17, 1024 }
  0x16   : > { %p962_p11 = scmp.ne.s32.totalorder %s261_s17, %s961_s20  ;;  %s1088_s21 = smov [#allocation2]  }
  0x17   : > { %s966_s29 = sshll.u32 %s1088_s21, 4  ;;  %s967_s29 = int_to_ptr.vmem [resolvable:$false] %s966_s29 }
  0x18   : > { %s259_s15 = scalar_lea.hbm %s1332_s2, %s800_s11  ;;  %p964_p12 = pnand %p962_p11, %p950_p10 }
  0x19   : > { %s968_s30 = scalar_lea.vmem %s967_s29, 2048  ;;  %p969_p0 = scmp.lt.s32.totalorder %s261_s17, %s967_s29 }
  0x1a   : > { %p965_p13 = pneg %p964_p12  ;;  %p970_p1 = scmp.lt.s32.totalorder %s968_s30, %s961_s20 }
  0x1c   : > { %p971_p2 = por %p970_p1, %p969_p0 }
  0x1e   : > { %p972_p3 = pnand %p971_p2, %p965_p13 }
  0x20   : > { %975 = shalt.err (!%p972_p3)
}
  0x21   : > { %s1089_s7 = smov 64   ;;  %s1090_s13 = smov 4  }
  0x22   : > { %871 = dma.hbm_to_vmem [thread:$0]  (!%p1196_p9), %s259_s15, 1024, %s261_s17, %s250_s19, %s1089_s7, %s1089_s7, %s1090_s13  }
  0x23   : > { %p774_p4 = scmp.ge.s32.totalorder %s1086_s26, 1  ;;  %p301_p5 = scmp.lt.s32.totalorder %s1086_s26, 5 }
  0x24   : > { %s286_s21 = scalar_lea.hbm %s1325_s4, %s800_s11  ;;  %s280_s29 = scalar_lea.vmem [#allocation5], %s768_s12 }
  0x25   : > { %p1210_p6 = pnand %p774_p4, %p301_p5  ;;  %s287_s30 = sshll.u32 %s280_s29, 4  ;;  %s288_s30 = int_to_ptr.vmem [resolvable:$true] %s287_s30 }
  0x26   : > { %s277_s27 = scalar_lea.sflag [#allocation6], %s1185_s10  ;;  %s989_s2 = scalar_lea.vmem %s288_s30, 1024 }
  0x27   : > { %p990_p8 = scmp.ne.s32.totalorder %s288_s30, %s989_s2  ;;  %s1091_s15 = smov [#allocation5]  }
  0x28   : > { %s994_s17 = sshll.u32 %s1091_s15, 4  ;;  %s995_s17 = int_to_ptr.vmem [resolvable:$false] %s994_s17 }
  0x29   : > { %p992_p11 = pnand %p990_p8, %p950_p10  ;;  %s996_s19 = scalar_lea.vmem %s995_s17, 2048 }
  0x2a   : > { %p997_p13 = scmp.lt.s32.totalorder %s288_s30, %s995_s17  ;;  %p998_p0 = scmp.lt.s32.totalorder %s996_s19, %s989_s2 }
  0x2b   : > { %p993_p12 = pneg %p992_p11 }
  0x2c   : > { %p999_p1 = por %p998_p0, %p997_p13 }
  0x2e   : > { %p1000_p2 = pnand %p999_p1, %p993_p12 }
  0x30   : > { %1003 = shalt.err (!%p1000_p2)
}
  0x31   : > { %874 = dma.hbm_to_vmem [thread:$0]  (!%p1196_p9), %s286_s21, 1024, %s288_s30, %s277_s27, %s1089_s7, %s1089_s7, %s1090_s13  }
  0x32   : > { %305 = sbr.rel (%p1210_p6) target bundleno = 502 (0x1f6), region = 44  ;;  %s307_s10 = sand.u32 (!%p1210_p6), 1, %s1070_s22  }
  0x33   : > { %s775_s11 = sshll.u32 (!%p1210_p6), %s307_s10, 6  ;;  %s308_s12 = scalar_lea.sflag (!%p1210_p6), [#allocation3], %s307_s10 }
  0x34   : > { %s1228_s16 = scalar_lea.vmem (!%p1210_p6), [#allocation2], %s775_s11 }
  0x37   : > { %1053 = dma.done.wait (%p1176_p7), %s308_s12, 1024  }
  0x38   : > { %1055 = vsyncadd (%p1176_p7), %s308_s12, 4294966272  ;;  %s317_s2 = scalar_lea.sflag [#allocation6], %s307_s10  ;;  %s1234_s20 = scalar_lea.vmem [#allocation5], %s775_s11 }
  0x39   : > { %1057 = dma.done.wait (%p1176_p7), %s317_s2, 1024  }
  0x3a   : > { %1059 = vsyncadd (%p1176_p7), %s317_s2, 4294966272  ;;  %p371_p9 = scmp.lt.s32.totalorder %s1078_s24, 3  ;;  %p777_p10 = scmp.ne.s32.totalorder %s1078_s24, 0 }
  0x3c   : > { %s1242_s27 = scalar_select %p371_p9, %s1078_s24, 3 }
  0x3d   : > { %381 = sbr.rel (%p777_p10) target bundleno = 68 (0x44), region = 56 }
  0x3e   : > { %s373_s13 = scalar_lea.vmem %s1324_s3, %s1242_s27  ;;  %s376_s29 = scalar_lea.vmem %s1326_s5, %s1242_s27 }
  0x42   : > { %v1092_v0 = vmov 0.0  }
  0x43   : > { %382 = vst [vmem:[#allocation7] sm:$0xff] %v1092_v0 }
  0x44 PF: > { %v932_v1 = vld [vmem:[%s1228_s16 + $0x38] sm:$0xff]   ;;  %v1093_v2 = vmov 0.0   ;;  %v933_v3 = vld [vmem:[%s1228_s16 + $0x30] sm:$0xff]   ;;  %vm1094_vm0 = vmmov 0   ;;  %v934_v4 = vld [vmem:[%s1228_s16 + $0x28] sm:$0xff]   ;;  %v384_v20 = vlaneseq  ;;  %v386_v21 = vstv %s1078_s24  ;;  %s1095_s12 = smov [#allocation7]  }
  0x45   : > { %820 = vmatprep.subr.bf16.mxu0 %v1093_v2  ;;  %840 = vmatprep.subr.bf16.mxu1 %v1093_v2  ;;  %v940_v5 = vld [vmem:[%s1234_s20 + $0x38] sm:$0xff]   ;;  %v935_v6 = vld [vmem:[%s1228_s16 + $0x20] sm:$0xff]   ;;  %v941_v7 = vld [vmem:[%s1234_s20 + $0x30] sm:$0xff]   ;;  %vm389_vm1 = vcmask 31744   ;;  %s1335_s2 = sadd.s32 4294967295, %s1086_s26  }
  0x46   : > { %821 = vmatpush3.bf16.msra.mxu0 %v932_v1  ;;  %836 = vmatprep.mubr.msk.bf16.mxu0 %vm1094_vm0, %v1093_v2  ;;  %v936_v8 = vld [vmem:[%s1228_s16 + $0x18] sm:$0xff]   ;;  %v942_v9 = vld [vmem:[%s1234_s20 + $0x28] sm:$0xff]   ;;  %v937_v10 = vld [vmem:[%s1228_s16 + $0x10] sm:$0xff]   ;;  %v385_v23 = vand.u32 127, %v384_v20  ;;  %p1288_p7 = scmp.eq.s32.totalorder %s1335_s2, 3 }
  0x47   : > { %822 = vmatprep.subr.bf16.mxu0 %v1093_v2  ;;  %856 = vmatprep.mubr.msk.bf16.mxu1 %vm1094_vm0, %v1093_v2  ;;  %v943_v11 = vld [vmem:[%s1234_s20 + $0x20] sm:$0xff]   ;;  %v938_v12 = vld [vmem:[%s1228_s16 + $0x8] sm:$0xff]   ;;  %v944_v13 = vld [vmem:[%s1234_s20 + $0x18] sm:$0xff]  }
  0x48   : > { %841 = vmatpush3.bf16.msra.mxu1 %v940_v5  ;;  %v939_v14 = vld [vmem:[%s1228_s16] sm:$0xff]   ;;  %v945_v16 = vld [vmem:[%s1234_s20 + $0x10] sm:$0xff]   ;;  %v946_v18 = vld [vmem:[%s1234_s20 + $0x8] sm:$0xff]   ;;  %vm387_vm2 = vcmp.eq.s32.totalorder %v385_v23, %v386_v21  ;;  %s631_s16 = sshll.u32 %s1095_s12, 4  ;;  %s632_s16 = int_to_ptr.vmem [resolvable:$true] %s631_s16 }
  0x49   : > { %842 = vmatprep.subr.bf16.mxu1 %v1093_v2  ;;  %v393_v15 = vld [vmem:[%s1322_s1] sm:$0xff]  ;;  %s1004_s27 = scalar_lea.vmem %s632_s16, 128  ;;  %p1011_p6 = scmp.lt.s32.totalorder %s632_s16, %s632_s16 }
  0x4a   : > { %823 = vmatpush3.bf16.msra.mxu0 %v933_v3  ;;  %v394_v17 = vpack.c.bf16 %v393_v15, %v393_v15  ;;  %v947_v19 = vld [vmem:[%s1234_s20] sm:$0xff]   ;;  %p1005_p3 = scmp.ne.s32.totalorder %s632_s16, %s1004_s27  ;;  %p1012_p8 = scmp.lt.s32.totalorder %s1004_s27, %s1004_s27 }
  0x4b   : > { %824 = vmatprep.subr.bf16.mxu0 %v1093_v2  ;;  %v383_v22 = vld [vmem:[%s1321_s0] sm:$0xff] }
  0x4c   : > { %843 = vmatpush3.bf16.msra.mxu1 %v941_v7  ;;  %v388_v24 = vsel %vm387_vm2, %v383_v22, 0.0  ;;  %v778_v26 = vld [vmem:[%s373_s13] ss:$0 sm:$0xff]  ;;  %p1006_p4 = pnand %p1005_p3, %p1288_p7  ;;  %p1013_p11 = por %p1012_p8, %p1011_p6 }
  0x4d   : > { %844 = vmatprep.subr.bf16.mxu1 %v1093_v2  ;;  %v390_v25 = vsel %vm389_vm1, %v388_v24, 0.0  ;;  %v787_v33 = vld [vmem:[%s376_s29] ss:$0 sm:$0xff] }
  0x4e   : > { %825 = vmatpush3.bf16.msra.mxu0 %v934_v4  ;;  %391 = vadd.xlane.f32.xlu0 %v390_v25  ;;  %v523_v37 = vld [vmem:[#allocation7] sm:$0xff]  ;;  %p1007_p5 = pneg %p1006_p4 }
  0x4f   : > { %826 = vmatprep.subr.bf16.mxu0 %v1093_v2 }
  0x50   : > { %845 = vmatpush3.bf16.msra.mxu1 %v942_v9  ;;  %p1014_p12 = pnand %p1013_p11, %p1007_p5 }
  0x51   : > { %846 = vmatprep.subr.bf16.mxu1 %v1093_v2 }
  0x52   : > { %827 = vmatpush3.bf16.msra.mxu0 %v935_v6 }
  0x53   : > { %828 = vmatprep.subr.bf16.mxu0 %v1093_v2 }
  0x54   : > { %847 = vmatpush3.bf16.msra.mxu1 %v943_v11 }
  0x55   : > { %848 = vmatprep.subr.bf16.mxu1 %v1093_v2 }
  0x56   : > { %829 = vmatpush3.bf16.msra.mxu0 %v936_v8 }
  0x57   : > { %830 = vmatprep.subr.bf16.mxu0 %v1093_v2 }
  0x58   : > { %849 = vmatpush3.bf16.msra.mxu1 %v944_v13 }
  0x59   : > { %850 = vmatprep.subr.bf16.mxu1 %v1093_v2 }
  0x5a   : > { %831 = vmatpush3.bf16.msra.mxu0 %v937_v10 }
  0x5b   : > { %832 = vmatprep.subr.bf16.mxu0 %v1093_v2 }
  0x5c   : > { %851 = vmatpush3.bf16.msra.mxu1 %v945_v16 }
  0x5d   : > { %852 = vmatprep.subr.bf16.mxu1 %v1093_v2 }
  0x5e   : > { %833 = vmatpush3.bf16.msra.mxu0 %v938_v12 }
  0x5f   : > { %834 = vmatprep.subr.bf16.mxu0 %v1093_v2 }
  0x60   : > { %853 = vmatpush3.bf16.msra.mxu1 %v946_v18 }
  0x61   : > { %854 = vmatprep.subr.bf16.mxu1 %v1093_v2 }
  0x62   : > { %835 = vmatpush3.bf16.msra.mxu0 %v939_v14 }
  0x64   : > { %855 = vmatpush3.bf16.msra.mxu1 %v947_v19 }
  0x65   : > { %837 = vmatmul.mubr.bf16.vlgmr.msra.gmra.mxu0 %v394_v17 }
  0xd7   : > { %v392_v35 = vpop.xlane.xlu0 %391 }
 0x125   : > { %v500_v27 = vpop.f32.mrf.mxu0 }
 0x126   : > { %v501_v28 = vadd.f32 %v778_v26, %v500_v27 }
 0x127   : > { %v838_v29 = vpop.f32.mrf.mxu0 }
 0x128   : > { %v506_v30 = vpack.c.bf16 %v501_v28, %v501_v28 }
 0x129   : > { %v503_v31 = vpop.f32.mrf.mxu0 }
 0x12a   : > { %857 = vmatmul.mubr.bf16.vlgmr.msra.gmra.mxu1 %v506_v30 }
 0x12b   : > { %v839_v32 = vpop.f32.mrf.mxu0 }
 0x1ea   : > { %v613_v34 = vpop.f32.mrf.mxu1 }
 0x1eb   : > { %v614_v36 = vadd.f32 %v787_v33, %v613_v34 }
 0x1ec   : > { %v858_v38 = vpop.f32.mrf.mxu1 }
 0x1ed   : > { %v619_v39 = vmul.f32 %v614_v36, %v392_v35 }
 0x1ee   : > { %v616_v40 = vpop.f32.mrf.mxu1 }
 0x1ef   : > { %v620_v41 = vadd.f32 %v619_v39, %v523_v37 }
 0x1f0   : > { %v859_v42 = vpop.f32.mrf.mxu1 }
 0x1f1   : > { %621 = vst [vmem:[#allocation7] sm:$0xff] %v620_v41 }
 0x1f2   : > { %1017 = shalt.err (!%p1014_p12)
}
 0x1f3   : > { %865 = dma.vmem_to_hbm [thread:$0]  (%p1288_p7), %s632_s16, 128, %s1327_s6, [#allocation4]  }
 0x1f4   : > { %1061 = dma.done.wait (%p1288_p7), [#allocation4], 128  }
 0x1f5   : > { %1063 = vsyncadd (%p1288_p7), [#allocation4], 4294967168 }
 0x1f6 PF: > { %s23_s26 = sadd.s32 1, %s1086_s26   ;;  %s1337_s21 = smov %s1070_s22 }
 0x1f7   : > { %p20_p13 = scmp.ge.s32.totalorder %s23_s26, 6   ;;  %s1338_s22 = smov %s1074_s23 }
 0x1f8   : > { %s1339_s23 = smov %s1182_s9  ;;  %s1340_s24 = smov %s1082_s25 }
 0x1f9   : > { %s1341_s25 = smov %s1343_s28  ;;  %22 = sbr.rel (!%p20_p13) target bundleno = 9 (0x9), region = 111 }
 0x1fe   :  { %644 = vsyncpa [#allocation3], 1 }
 0x1ff   :  { %646 = vsyncpa [#allocation3 + $0x1], 1 }
 0x200   :  { %647 = vsyncpa [#allocation6], 1 }
 0x201   :  { %649 = vsyncpa [#allocation6 + $0x1], 1 }
 0x202   :  { %650 = vsyncpa [#allocation4], 1 }
 0x203   :  { %652 = vsyncpa [#allocation4 + $0x1], 1 }

</bundles_post_ra>
